<compile_context>
chip_gen: v7x
topology: tpu7x:2x2x1
jax: 0.10.0
libtpu: 0.0.40
codegen_flags: <defaults>
</compile_context>

<pallas_src>
import jax
import jax.numpy as jnp
from jax.experimental import pallas as pl
from jax.experimental.pallas import tpu as pltpu


def cvae_kernel(
    x_ref, c_ref, eps_ref,
    w_e1x_ref, w_e1c_ref,
    w_e2_ref,
    w_e34_ref,
    w_d1z_ref, w_d1c_ref,
    w_d2_ref,
    w_d3_ref,
    b_ref,          # [6, max_out] packed biases: e1, e2, e34, d1, d2, d3
    out_ref,        # [TB, input_size + 2*latent]  = (xhat | mu | logvar)
):
    f32 = jnp.float32
    units = w_e1x_ref.shape[1]
    half = w_e2_ref.shape[1]
    two_latent = w_e34_ref.shape[1]
    latent = two_latent // 2
    input_size = w_d3_ref.shape[1]

    x = x_ref[...]
    c = c_ref[...]

    # ---- encoder: cat([x, c]) @ W_e1 == x @ W_e1x + c @ W_e1c ----
    h1 = (jnp.dot(x, w_e1x_ref[...], preferred_element_type=f32)
          + jnp.dot(c, w_e1c_ref[...], preferred_element_type=f32)
          + b_ref[0:1, :units])
    h2 = (jnp.dot(h1, w_e2_ref[...], preferred_element_type=f32)
          + b_ref[1:2, :half])

    # fused (mu | logvar) in one dot
    ml = (jnp.dot(h2, w_e34_ref[...], preferred_element_type=f32)
          + b_ref[2:3, :two_latent])
    mu = ml[:, :latent]
    logvar = ml[:, latent:]

    # ---- reparametrize: z = eps * exp(0.5 * logvar) + mu ----
    std = jnp.exp(0.5 * logvar)
    z = eps_ref[...] * std + mu

    # ---- decoder: cat([z, c]) @ W_d1 == z @ W_d1z + c @ W_d1c ----
    d1 = (jnp.dot(z, w_d1z_ref[...], preferred_element_type=f32)
          + jnp.dot(c, w_d1c_ref[...], preferred_element_type=f32)
          + b_ref[3:4, :half])
    d2 = (jnp.dot(d1, w_d2_ref[...], preferred_element_type=f32)
          + b_ref[4:5, :units])
    xhat = (jnp.dot(d2, w_d3_ref[...], preferred_element_type=f32)
            + b_ref[5:6, :input_size])

    # packed, lane-contiguous output slab
    out_ref[...] = jnp.concatenate([xhat, mu, logvar], axis=1)


def make_cvae_params(key, input_size, latent_size, class_size, units):
    """Deterministic synthetic parameters. Weights stored [in, out]."""
    half = units // 2

    def linear(k, fan_in, fan_out):
        kw, kb = jax.random.split(k)
        bound = 1.0 / jnp.sqrt(fan_in)
        w = jax.random.uniform(kw, (fan_in, fan_out), jnp.float32, -bound, bound)
        b = jax.random.uniform(kb, (1, fan_out), jnp.float32, -bound, bound)
        return w, b

    keys = jax.random.split(key, 7)
    w_e1, b_e1 = linear(keys[0], input_size + class_size, units)
    w_e2, b_e2 = linear(keys[1], units, half)
    w_e3, b_e3 = linear(keys[2], half, latent_size)
    w_e4, b_e4 = linear(keys[3], half, latent_size)
    w_d1, b_d1 = linear(keys[4], latent_size + class_size, half)
    w_d2, b_d2 = linear(keys[5], half, units)
    w_d3, b_d3 = linear(keys[6], units, input_size)
    return dict(
        w_e1=w_e1, b_e1=b_e1, w_e2=w_e2, b_e2=b_e2,
        w_e3=w_e3, b_e3=b_e3, w_e4=w_e4, b_e4=b_e4,
        w_d1=w_d1, b_d1=b_d1, w_d2=w_d2, b_d2=b_d2,
        w_d3=w_d3, b_d3=b_d3,
    )


def _pack_biases(params, units, half, latent_size, input_size):
    """Stack all biases into one [6, max_out] zero-padded slab (single DMA)."""
    max_out = max(units, half, 2 * latent_size, input_size)

    def pad_row(b, width):
        b = b.reshape(1, -1).astype(jnp.float32)
        return jnp.pad(b, ((0, 0), (0, max_out - width)))

    b_e34 = jnp.concatenate([params["b_e3"], params["b_e4"]], axis=1)
    rows = [
        pad_row(params["b_e1"], units),
        pad_row(params["b_e2"], half),
        pad_row(b_e34, 2 * latent_size),
        pad_row(params["b_d1"], half),
        pad_row(params["b_d2"], units),
        pad_row(params["b_d3"], input_size),
    ]
    return jnp.concatenate(rows, axis=0)


def cvae_forward(x, c, eps, params, latent_size):
    """Fused CVAE forward Pallas kernel.

    x:   [B, input_size]  float32
    c:   [B, class_size]  float32
    eps: [B, latent_size] float32 (standard-normal noise)
    Returns (x_hat, mu, logvar) matching the PyTorch forward.
    """
    x = x.astype(jnp.float32)
    c = c.astype(jnp.float32)
    eps = eps.astype(jnp.float32)

    B, input_size = x.shape
    class_size = c.shape[1]
    units = params["w_e1"].shape[1]
    half = params["w_e2"].shape[1]

    # split encode1 / decode1 weights (rows = input features)
    w_e1x = params["w_e1"][:input_size, :]
    w_e1c = params["w_e1"][input_size:, :]
    w_d1z = params["w_d1"][:latent_size, :]
    w_d1c = params["w_d1"][latent_size:, :]
    # fuse encode3 / encode4 into one [half, 2*latent] weight
    w_e34 = jnp.concatenate([params["w_e3"], params["w_e4"]], axis=1)
    # pack all biases into one slab
    b_slab = _pack_biases(params, units, half, latent_size, input_size)

    # batch tile: full batch if small, else 128-row tiles (pipelined).
    TB = B if B <= 128 else 128
    grid = (pl.cdiv(B, TB),)

    def act_spec(feat):
        return pl.BlockSpec((TB, feat), lambda i: (i, 0))

    def resident_spec(arr):
        # full-array block, same index every grid step -> stays VMEM-resident
        return pl.BlockSpec(arr.shape, lambda i: (0, 0))

    out_width = input_size + 2 * latent_size
    out_shape = jax.ShapeDtypeStruct((B, out_width), jnp.float32)

    inputs = (
        x, c, eps,
        w_e1x, w_e1c,
        params["w_e2"],
        w_e34,
        w_d1z, w_d1c,
        params["w_d2"],
        params["w_d3"],
        b_slab,
    )

    in_specs = [
        act_spec(input_size), act_spec(class_size), act_spec(latent_size),
        resident_spec(w_e1x), resident_spec(w_e1c),
        resident_spec(params["w_e2"]),
        resident_spec(w_e34),
        resident_spec(w_d1z), resident_spec(w_d1c),
        resident_spec(params["w_d2"]),
        resident_spec(params["w_d3"]),
        resident_spec(b_slab),
    ]

    packed = pl.pallas_call(
        cvae_kernel,
        out_shape=out_shape,
        grid_spec=pltpu.PrefetchScalarGridSpec(
            num_scalar_prefetch=0,
            grid=grid,
            in_specs=in_specs,
            out_specs=pl.BlockSpec((TB, out_width), lambda i: (i, 0)),
        ),
        compiler_params=pltpu.CompilerParams(
            dimension_semantics=("parallel",),
        ),
    )(*inputs)

    x_hat = packed[:, :input_size]
    mu = packed[:, input_size:input_size + latent_size]
    logvar = packed[:, input_size + latent_size:]
    return x_hat, mu, logvar


def cvae_forward_ref(x, c, eps, params, latent_size):
    """Pure-JAX reference for correctness checking."""
    xc = jnp.concatenate([x, c], axis=1)
    h1 = xc @ params["w_e1"] + params["b_e1"]
    h2 = h1 @ params["w_e2"] + params["b_e2"]
    mu = h2 @ params["w_e3"] + params["b_e3"]
    logvar = h2 @ params["w_e4"] + params["b_e4"]
    std = jnp.exp(0.5 * logvar)
    z = eps * std + mu
    zc = jnp.concatenate([z, c], axis=1)
    d1 = zc @ params["w_d1"] + params["b_d1"]
    d2 = d1 @ params["w_d2"] + params["b_d2"]
    x_hat = d2 @ params["w_d3"] + params["b_d3"]
    return x_hat, mu, logvar


if __name__ == "__main__":
    # Small shapes consistent with the module's forward.
    batch = 8
    input_size = 32
    latent_size = 8
    class_size = 8
    units = 32

    key = jax.random.PRNGKey(0)
    k_params, k_x, k_c, k_eps = jax.random.split(key, 4)

    params = make_cvae_params(k_params, input_size, latent_size, class_size, units)

    x = jax.random.normal(k_x, (batch, input_size), jnp.float32)
    c = (jax.random.uniform(k_c, (batch, class_size)) > 0.5).astype(jnp.float32)
    eps = jax.random.normal(k_eps, (batch, latent_size), jnp.float32)

    x_hat, mu, logvar = cvae_forward(x, c, eps, params, latent_size)
    jax.block_until_ready((x_hat, mu, logvar))

    # correctness check against pure-JAX reference
    x_hat_r, mu_r, logvar_r = cvae_forward_ref(x, c, eps, params, latent_size)
    assert jnp.allclose(x_hat, x_hat_r, atol=1e-4, rtol=1e-4)
    assert jnp.allclose(mu, mu_r, atol=1e-4, rtol=1e-4)
    assert jnp.allclose(logvar, logvar_r, atol=1e-4, rtol=1e-4)

    print("KERNEL_OK")
</pallas_src>

<mosaic_0001>
module attributes {stable_mosaic.version = 11 : i64} {
  func.func @cvae_kernel(%arg0: i32, %arg1: memref<8x32xf32, #tpu.memory_space<vmem>>, %arg2: memref<8x8xf32, #tpu.memory_space<vmem>>, %arg3: memref<8x8xf32, #tpu.memory_space<vmem>>, %arg4: memref<32x32xf32, #tpu.memory_space<vmem>>, %arg5: memref<8x32xf32, #tpu.memory_space<vmem>>, %arg6: memref<32x16xf32, #tpu.memory_space<vmem>>, %arg7: memref<16x16xf32, #tpu.memory_space<vmem>>, %arg8: memref<8x16xf32, #tpu.memory_space<vmem>>, %arg9: memref<8x16xf32, #tpu.memory_space<vmem>>, %arg10: memref<16x32xf32, #tpu.memory_space<vmem>>, %arg11: memref<32x32xf32, #tpu.memory_space<vmem>>, %arg12: memref<6x32xf32, #tpu.memory_space<vmem>>, %arg13: memref<8x48xf32, #tpu.memory_space<vmem>>) attributes {dimension_semantics = [#tpu.dimension_semantics<parallel>], iteration_bounds = array<i64: 1>, scalar_prefetch = 0 : i64, scratch_operands = 0 : i64, tpu.core_type = #tpu.core_type<tc>, window_params = [{transform_indices = @transform_0, window_bounds = array<i64: 8, 32>}, {transform_indices = @transform_1, window_bounds = array<i64: 8, 8>}, {transform_indices = @transform_2, window_bounds = array<i64: 8, 8>}, {pipeline_mode = #tpu.pipeline_mode<synchronous>, transform_indices = @transform_3, window_bounds = array<i64: 32, 32>}, {pipeline_mode = #tpu.pipeline_mode<synchronous>, transform_indices = @transform_4, window_bounds = array<i64: 8, 32>}, {pipeline_mode = #tpu.pipeline_mode<synchronous>, transform_indices = @transform_5, window_bounds = array<i64: 32, 16>}, {pipeline_mode = #tpu.pipeline_mode<synchronous>, transform_indices = @transform_6, window_bounds = array<i64: 16, 16>}, {pipeline_mode = #tpu.pipeline_mode<synchronous>, transform_indices = @transform_7, window_bounds = array<i64: 8, 16>}, {pipeline_mode = #tpu.pipeline_mode<synchronous>, transform_indices = @transform_8, window_bounds = array<i64: 8, 16>}, {pipeline_mode = #tpu.pipeline_mode<synchronous>, transform_indices = @transform_9, window_bounds = array<i64: 16, 32>}, {pipeline_mode = #tpu.pipeline_mode<synchronous>, transform_indices = @transform_10, window_bounds = array<i64: 32, 32>}, {pipeline_mode = #tpu.pipeline_mode<synchronous>, transform_indices = @transform_11, window_bounds = array<i64: 6, 32>}, {transform_indices = @transform_12, window_bounds = array<i64: 8, 48>}]} {
    %c0 = arith.constant 0 : index
    %c0_0 = arith.constant 0 : index
    %0 = vector.load %arg1[%c0, %c0_0] : memref<8x32xf32, #tpu.memory_space<vmem>>, vector<8x32xf32>
    %c0_1 = arith.constant 0 : index
    %c0_2 = arith.constant 0 : index
    %1 = vector.load %arg2[%c0_1, %c0_2] : memref<8x8xf32, #tpu.memory_space<vmem>>, vector<8x8xf32>
    %c0_3 = arith.constant 0 : index
    %c0_4 = arith.constant 0 : index
    %2 = vector.load %arg4[%c0_3, %c0_4] : memref<32x32xf32, #tpu.memory_space<vmem>>, vector<32x32xf32>
    %cst = arith.constant dense<0.000000e+00> : vector<8x32xf32>
    %3 = tpu.matmul %0, %2, %cst {dimension_numbers = #tpu.dot_dimension_numbers<[1], [0], [0], [1], [0, 0, 1, 1], [], []>} : vector<8x32xf32>, vector<32x32xf32>, vector<8x32xf32> -> vector<8x32xf32>
    %c0_5 = arith.constant 0 : index
    %c0_6 = arith.constant 0 : index
    %4 = vector.load %arg5[%c0_5, %c0_6] : memref<8x32xf32, #tpu.memory_space<vmem>>, vector<8x32xf32>
    %cst_7 = arith.constant dense<0.000000e+00> : vector<8x32xf32>
    %5 = tpu.matmul %1, %4, %cst_7 {dimension_numbers = #tpu.dot_dimension_numbers<[1], [0], [0], [1], [0, 0, 1, 1], [], []>} : vector<8x8xf32>, vector<8x32xf32>, vector<8x32xf32> -> vector<8x32xf32>
    %6 = arith.addf %3, %5 : vector<8x32xf32>
    %c0_8 = arith.constant 0 : index
    %c0_9 = arith.constant 0 : index
    %7 = vector.load %arg12[%c0_8, %c0_9] : memref<6x32xf32, #tpu.memory_space<vmem>>, vector<1x32xf32>
    %8 = vector.broadcast %7 : vector<1x32xf32> to vector<8x32xf32>
    %9 = arith.addf %6, %8 : vector<8x32xf32>
    %c0_10 = arith.constant 0 : index
    %c0_11 = arith.constant 0 : index
    %10 = vector.load %arg6[%c0_10, %c0_11] : memref<32x16xf32, #tpu.memory_space<vmem>>, vector<32x16xf32>
    %cst_12 = arith.constant dense<0.000000e+00> : vector<8x16xf32>
    %11 = tpu.matmul %9, %10, %cst_12 {dimension_numbers = #tpu.dot_dimension_numbers<[1], [0], [0], [1], [0, 0, 1, 1], [], []>} : vector<8x32xf32>, vector<32x16xf32>, vector<8x16xf32> -> vector<8x16xf32>
    %c1 = arith.constant 1 : index
    %c0_13 = arith.constant 0 : index
    %12 = vector.load %arg12[%c1, %c0_13] : memref<6x32xf32, #tpu.memory_space<vmem>>, vector<1x16xf32>
    %13 = vector.broadcast %12 : vector<1x16xf32> to vector<8x16xf32>
    %14 = arith.addf %11, %13 : vector<8x16xf32>
    %c0_14 = arith.constant 0 : index
    %c0_15 = arith.constant 0 : index
    %15 = vector.load %arg7[%c0_14, %c0_15] : memref<16x16xf32, #tpu.memory_space<vmem>>, vector<16x16xf32>
    %cst_16 = arith.constant dense<0.000000e+00> : vector<8x16xf32>
    %16 = tpu.matmul %14, %15, %cst_16 {dimension_numbers = #tpu.dot_dimension_numbers<[1], [0], [0], [1], [0, 0, 1, 1], [], []>} : vector<8x16xf32>, vector<16x16xf32>, vector<8x16xf32> -> vector<8x16xf32>
    %c2 = arith.constant 2 : index
    %c0_17 = arith.constant 0 : index
    %17 = vector.load %arg12[%c2, %c0_17] : memref<6x32xf32, #tpu.memory_space<vmem>>, vector<1x16xf32>
    %18 = vector.broadcast %17 : vector<1x16xf32> to vector<8x16xf32>
    %19 = arith.addf %16, %18 : vector<8x16xf32>
    %20 = vector.extract_strided_slice %19 {offsets = [0, 0], sizes = [8, 8], strides = [1, 1]} : vector<8x16xf32> to vector<8x8xf32>
    %21 = vector.extract_strided_slice %19 {offsets = [0, 8], sizes = [8, 8], strides = [1, 1]} : vector<8x16xf32> to vector<8x8xf32>
    %cst_18 = arith.constant 5.000000e-01 : f32
    %22 = vector.broadcast %cst_18 : f32 to vector<8x8xf32>
    %23 = arith.mulf %22, %21 : vector<8x8xf32>
    %24 = math.exp %23 : vector<8x8xf32>
    %c0_19 = arith.constant 0 : index
    %c0_20 = arith.constant 0 : index
    %25 = vector.load %arg3[%c0_19, %c0_20] : memref<8x8xf32, #tpu.memory_space<vmem>>, vector<8x8xf32>
    %26 = arith.mulf %25, %24 : vector<8x8xf32>
    %27 = arith.addf %26, %20 : vector<8x8xf32>
    %c0_21 = arith.constant 0 : index
    %c0_22 = arith.constant 0 : index
    %28 = vector.load %arg8[%c0_21, %c0_22] : memref<8x16xf32, #tpu.memory_space<vmem>>, vector<8x16xf32>
    %cst_23 = arith.constant dense<0.000000e+00> : vector<8x16xf32>
    %29 = tpu.matmul %27, %28, %cst_23 {dimension_numbers = #tpu.dot_dimension_numbers<[1], [0], [0], [1], [0, 0, 1, 1], [], []>} : vector<8x8xf32>, vector<8x16xf32>, vector<8x16xf32> -> vector<8x16xf32>
    %c0_24 = arith.constant 0 : index
    %c0_25 = arith.constant 0 : index
    %30 = vector.load %arg9[%c0_24, %c0_25] : memref<8x16xf32, #tpu.memory_space<vmem>>, vector<8x16xf32>
    %cst_26 = arith.constant dense<0.000000e+00> : vector<8x16xf32>
    %31 = tpu.matmul %1, %30, %cst_26 {dimension_numbers = #tpu.dot_dimension_numbers<[1], [0], [0], [1], [0, 0, 1, 1], [], []>} : vector<8x8xf32>, vector<8x16xf32>, vector<8x16xf32> -> vector<8x16xf32>
    %32 = arith.addf %29, %31 : vector<8x16xf32>
    %c3 = arith.constant 3 : index
    %c0_27 = arith.constant 0 : index
    %33 = vector.load %arg12[%c3, %c0_27] : memref<6x32xf32, #tpu.memory_space<vmem>>, vector<1x16xf32>
    %34 = vector.broadcast %33 : vector<1x16xf32> to vector<8x16xf32>
    %35 = arith.addf %32, %34 : vector<8x16xf32>
    %c0_28 = arith.constant 0 : index
    %c0_29 = arith.constant 0 : index
    %36 = vector.load %arg10[%c0_28, %c0_29] : memref<16x32xf32, #tpu.memory_space<vmem>>, vector<16x32xf32>
    %cst_30 = arith.constant dense<0.000000e+00> : vector<8x32xf32>
    %37 = tpu.matmul %35, %36, %cst_30 {dimension_numbers = #tpu.dot_dimension_numbers<[1], [0], [0], [1], [0, 0, 1, 1], [], []>} : vector<8x16xf32>, vector<16x32xf32>, vector<8x32xf32> -> vector<8x32xf32>
    %c4 = arith.constant 4 : index
    %c0_31 = arith.constant 0 : index
    %38 = vector.load %arg12[%c4, %c0_31] : memref<6x32xf32, #tpu.memory_space<vmem>>, vector<1x32xf32>
    %39 = vector.broadcast %38 : vector<1x32xf32> to vector<8x32xf32>
    %40 = arith.addf %37, %39 : vector<8x32xf32>
    %c0_32 = arith.constant 0 : index
    %c0_33 = arith.constant 0 : index
    %41 = vector.load %arg11[%c0_32, %c0_33] : memref<32x32xf32, #tpu.memory_space<vmem>>, vector<32x32xf32>
    %cst_34 = arith.constant dense<0.000000e+00> : vector<8x32xf32>
    %42 = tpu.matmul %40, %41, %cst_34 {dimension_numbers = #tpu.dot_dimension_numbers<[1], [0], [0], [1], [0, 0, 1, 1], [], []>} : vector<8x32xf32>, vector<32x32xf32>, vector<8x32xf32> -> vector<8x32xf32>
    %c5 = arith.constant 5 : index
    %c0_35 = arith.constant 0 : index
    %43 = vector.load %arg12[%c5, %c0_35] : memref<6x32xf32, #tpu.memory_space<vmem>>, vector<1x32xf32>
    %44 = vector.broadcast %43 : vector<1x32xf32> to vector<8x32xf32>
    %45 = arith.addf %42, %44 : vector<8x32xf32>
    %46 = tpu.concatenate %45, %20, %21 in 1 : vector<8x32xf32>, vector<8x8xf32>, vector<8x8xf32> -> vector<8x48xf32>
    %c0_36 = arith.constant 0 : index
    %c0_37 = arith.constant 0 : index
    %47 = vector.load %arg13[%c0_36, %c0_37] : memref<8x48xf32, #tpu.memory_space<vmem>>, vector<8x48xf32>
    tpu.vector_store %arg13[%c0_36, %c0_37], %46 {strides = array<i32>} : memref<8x48xf32, #tpu.memory_space<vmem>>, vector<8x48xf32>,
    return
  }
  func.func @transform_0(%arg0: i32) -> (i32, i32) {
    %c0_i32 = arith.constant 0 : i32
    %c0_i32_0 = arith.constant 0 : i32
    return %arg0, %c0_i32 : i32, i32
  }
  func.func @transform_1(%arg0: i32) -> (i32, i32) {
    %c0_i32 = arith.constant 0 : i32
    %c0_i32_0 = arith.constant 0 : i32
    return %arg0, %c0_i32 : i32, i32
  }
  func.func @transform_2(%arg0: i32) -> (i32, i32) {
    %c0_i32 = arith.constant 0 : i32
    %c0_i32_0 = arith.constant 0 : i32
    return %arg0, %c0_i32 : i32, i32
  }
  func.func @transform_3(%arg0: i32) -> (i32, i32) {
    %c0_i32 = arith.constant 0 : i32
    %c0_i32_0 = arith.constant 0 : i32
    %c0_i32_1 = arith.constant 0 : i32
    return %c0_i32, %c0_i32_0 : i32, i32
  }
  func.func @transform_4(%arg0: i32) -> (i32, i32) {
    %c0_i32 = arith.constant 0 : i32
    %c0_i32_0 = arith.constant 0 : i32
    %c0_i32_1 = arith.constant 0 : i32
    return %c0_i32, %c0_i32_0 : i32, i32
  }
  func.func @transform_5(%arg0: i32) -> (i32, i32) {
    %c0_i32 = arith.constant 0 : i32
    %c0_i32_0 = arith.constant 0 : i32
    %c0_i32_1 = arith.constant 0 : i32
    return %c0_i32, %c0_i32_0 : i32, i32
  }
  func.func @transform_6(%arg0: i32) -> (i32, i32) {
    %c0_i32 = arith.constant 0 : i32
    %c0_i32_0 = arith.constant 0 : i32
    %c0_i32_1 = arith.constant 0 : i32
    return %c0_i32, %c0_i32_0 : i32, i32
  }
  func.func @transform_7(%arg0: i32) -> (i32, i32) {
    %c0_i32 = arith.constant 0 : i32
    %c0_i32_0 = arith.constant 0 : i32
    %c0_i32_1 = arith.constant 0 : i32
    return %c0_i32, %c0_i32_0 : i32, i32
  }
  func.func @transform_8(%arg0: i32) -> (i32, i32) {
    %c0_i32 = arith.constant 0 : i32
    %c0_i32_0 = arith.constant 0 : i32
    %c0_i32_1 = arith.constant 0 : i32
    return %c0_i32, %c0_i32_0 : i32, i32
  }
  func.func @transform_9(%arg0: i32) -> (i32, i32) {
    %c0_i32 = arith.constant 0 : i32
    %c0_i32_0 = arith.constant 0 : i32
    %c0_i32_1 = arith.constant 0 : i32
    return %c0_i32, %c0_i32_0 : i32, i32
  }
  func.func @transform_10(%arg0: i32) -> (i32, i32) {
    %c0_i32 = arith.constant 0 : i32
    %c0_i32_0 = arith.constant 0 : i32
    %c0_i32_1 = arith.constant 0 : i32
    return %c0_i32, %c0_i32_0 : i32, i32
  }
  func.func @transform_11(%arg0: i32) -> (i32, i32) {
    %c0_i32 = arith.constant 0 : i32
    %c0_i32_0 = arith.constant 0 : i32
    %c0_i32_1 = arith.constant 0 : i32
    return %c0_i32, %c0_i32_0 : i32, i32
  }
  func.func @transform_12(%arg0: i32) -> (i32, i32) {
    %c0_i32 = arith.constant 0 : i32
    %c0_i32_0 = arith.constant 0 : i32
    return %arg0, %c0_i32 : i32, i32
  }
}

</mosaic_0001>

<bundles_post_ra>
// kernel: tpu_custom_call.1
= control target key start
LH: loop header
LB: loop body
LE: loop exit
PB: predicated region body
PF: predicated region fallthrough
CT: control target
= control target key end

     0   :  { %17 = vsyncpa [#allocation3], 0  ;;  %s1408_s0 = inlined_call_operand.hbm [shape: f32[8,32], index: 0, kind: input, shape index: {}]   ;;  %s1409_s1 = inlined_call_operand.hbm [shape: f32[8,8], index: 1, kind: input, shape index: {}]   ;;  %s1410_s2 = inlined_call_operand.hbm [shape: f32[8,8], index: 2, kind: input, shape index: {}]   ;;  %s1411_s3 = inlined_call_operand.vmem [shape: f32[32,32], index: 3, kind: input, shape index: {}]   ;;  %s1412_s4 = inlined_call_operand.hbm [shape: f32[8,32], index: 4, kind: input, shape index: {}]   ;;  %s1413_s5 = inlined_call_operand.vmem [shape: f32[32,16], index: 5, kind: input, shape index: {}]   ;;  %s1414_s6 = inlined_call_operand.hbm [shape: f32[16,16], index: 6, kind: input, shape index: {}]   ;;  %s1415_s7 = inlined_call_operand.hbm [shape: f32[8,16], index: 7, kind: input, shape index: {}]   ;;  %s1416_s8 = inlined_call_operand.hbm [shape: f32[8,16], index: 8, kind: input, shape index: {}]   ;;  %s1417_s9 = inlined_call_operand.vmem [shape: f32[16,32], index: 9, kind: input, shape index: {}]   ;;  %s1418_s10 = inlined_call_operand.vmem [shape: f32[32,32], index: 10, kind: input, shape index: {}]   ;;  %s1419_s11 = inlined_call_operand.vmem [shape: f32[6,32], index: 11, kind: input, shape index: {}]   ;;  %s1420_s12 = inlined_call_operand.hbm [shape: f32[8,48], index: 12, kind: output, shape index: {}]  }
   0x1   :  { %18 = vsyncpa [#allocation6], 0 }
   0x2   :  { %19 = vsyncpa [#allocation9], 0 }
   0x3   :  { %20 = vsyncpa [#allocation12], 0 }
   0x4   :  { %21 = vsyncpa [#allocation4], 0  ;;  %s1129_s21 = smov [#allocation5]   ;;  %s1130_s23 = smov [#allocation8]  }
   0x5   :  { %s38_s22 = sshll.u32 %s1129_s21, 4  ;;  %s60_s24 = sshll.u32 %s1130_s23, 4  ;;  %s39_s22 = int_to_ptr.vmem [resolvable:$true] %s38_s22  ;;  %s61_s24 = int_to_ptr.vmem [resolvable:$true] %s60_s24 }
   0x6   :  { %s943_s27 = scalar_lea.hbm %s1409_s1, 128 }
   0x7   :  { %p944_p0 = scmp.ne.s32.totalorder %s1409_s1, %s943_s27  ;;  %p947_p1 = scmp.lt.u32.totalorder %s943_s27, %s1409_s1 }
   0x9   :  { %p949_p2 = pnand %p947_p1, %p944_p0 }
   0xb   :  { %952 = shalt.err (!%p949_p2)
}
   0xc   :  { %s953_s14 = scalar_lea.vmem %s39_s22, 128  ;;  %p958_p4 = scmp.lt.s32.totalorder %s39_s22, %s39_s22 }
   0xd   :  { %p954_p3 = scmp.ne.s32.totalorder %s39_s22, %s953_s14  ;;  %p959_p5 = scmp.lt.s32.totalorder %s953_s14, %s953_s14 }
   0xf   :  { %p960_p6 = por %p959_p5, %p958_p4 }
  0x11   :  { %p961_p7 = pnand %p960_p6, %p954_p3 }
  0x13   :  { %964 = shalt.err (!%p961_p7)
}
  0x14   :  { %41 = dma.hbm_to_vmem [thread:$0]  %s1409_s1, 128, %s39_s22, [#allocation6]  }
  0x15   :  { %s965_s19 = scalar_lea.hbm %s1412_s4, 128 }
  0x16   :  { %p966_p8 = scmp.ne.s32.totalorder %s1412_s4, %s965_s19  ;;  %p969_p9 = scmp.lt.u32.totalorder %s965_s19, %s1412_s4 }
  0x18   :  { %p971_p10 = pnand %p969_p9, %p966_p8 }
  0x1a   :  { %974 = shalt.err (!%p971_p10)
}
  0x1b   :  { %s975_s26 = scalar_lea.vmem %s61_s24, 128  ;;  %p980_p12 = scmp.lt.s32.totalorder %s61_s24, %s61_s24 }
  0x1c   :  { %p976_p11 = scmp.ne.s32.totalorder %s61_s24, %s975_s26  ;;  %p981_p13 = scmp.lt.s32.totalorder %s975_s26, %s975_s26 }
  0x1e   :  { %p982_p0 = por %p981_p13, %p980_p12 }
  0x20   :  { %p983_p1 = pnand %p982_p0, %p976_p11 }
  0x22   :  { %986 = shalt.err (!%p983_p1)
}
  0x23   :  { %63 = dma.hbm_to_vmem [thread:$0]  %s1412_s4, 128, %s61_s24, [#allocation9]  }
  0x24   :  { %s1131_s27 = smov [#allocation11]   ;;  %s1132_s29 = smov [#allocation2]  }
  0x25   :  { %s84_s28 = sshll.u32 %s1131_s27, 4  ;;  %s28_s30 = sshll.u32 %s1132_s29, 4  ;;  %s85_s28 = int_to_ptr.vmem [resolvable:$true] %s84_s28  ;;  %s29_s30 = int_to_ptr.vmem [resolvable:$true] %s28_s30 }
  0x26   :  { %s987_s15 = scalar_lea.hbm %s1415_s7, 128 }
  0x27   :  { %p988_p2 = scmp.ne.s32.totalorder %s1415_s7, %s987_s15  ;;  %p991_p3 = scmp.lt.u32.totalorder %s987_s15, %s1415_s7 }
  0x29   :  { %p993_p4 = pnand %p991_p3, %p988_p2 }
  0x2b   :  { %996 = shalt.err (!%p993_p4)
}
  0x2c   :  { %s997_s4 = scalar_lea.vmem %s85_s28, 128  ;;  %p1002_p6 = scmp.lt.s32.totalorder %s85_s28, %s85_s28 }
  0x2d   :  { %p998_p5 = scmp.ne.s32.totalorder %s85_s28, %s997_s4  ;;  %p1003_p7 = scmp.lt.s32.totalorder %s997_s4, %s997_s4 }
  0x2f   :  { %p1004_p8 = por %p1003_p7, %p1002_p6 }
  0x31   :  { %p1005_p9 = pnand %p1004_p8, %p998_p5 }
  0x33   :  { %1008 = shalt.err (!%p1005_p9)
}
  0x34   :  { %87 = dma.hbm_to_vmem [thread:$0]  %s1415_s7, 128, %s85_s28, [#allocation12]  }
  0x35   :  { %s1009_s25 = scalar_lea.hbm %s1408_s0, 128 }
  0x36   :  { %p1010_p10 = scmp.ne.s32.totalorder %s1408_s0, %s1009_s25  ;;  %p1013_p11 = scmp.lt.u32.totalorder %s1009_s25, %s1408_s0 }
  0x38   :  { %p1015_p12 = pnand %p1013_p11, %p1010_p10 }
  0x3a   :  { %1018 = shalt.err (!%p1015_p12)
}
  0x3b   :  { %s1019_s29 = scalar_lea.vmem %s29_s30, 128  ;;  %p1024_p0 = scmp.lt.s32.totalorder %s29_s30, %s29_s30 }
  0x3c   :  { %p1020_p13 = scmp.ne.s32.totalorder %s29_s30, %s1019_s29  ;;  %p1025_p1 = scmp.lt.s32.totalorder %s1019_s29, %s1019_s29 }
  0x3e   :  { %p1026_p2 = por %p1025_p1, %p1024_p0 }
  0x40   :  { %p1027_p3 = pnand %p1026_p2, %p1020_p13 }
  0x42   :  { %1030 = shalt.err (!%p1027_p3)
}
  0x43   :  { %31 = dma.hbm_to_vmem [thread:$0]  %s1408_s0, 128, %s29_s30, [#allocation3]  }
  0x44   :  { %s1133_s13 = smov [#allocation7]   ;;  %s1134_s15 = smov [#allocation10]  }
  0x45   :  { %s48_s14 = sshll.u32 %s1133_s13, 4  ;;  %s71_s16 = sshll.u32 %s1134_s15, 4  ;;  %s49_s14 = int_to_ptr.vmem [resolvable:$true] %s48_s14  ;;  %s1257_s16 = int_to_ptr.vmem [resolvable:$true] %s71_s16 }
  0x46   :  { %s1031_s19 = scalar_lea.hbm %s1410_s2, 128 }
  0x47   :  { %p1032_p4 = scmp.ne.s32.totalorder %s1410_s2, %s1031_s19  ;;  %p1035_p5 = scmp.lt.u32.totalorder %s1031_s19, %s1410_s2 }
  0x49   :  { %p1037_p6 = pnand %p1035_p5, %p1032_p4 }
  0x4b   :  { %1040 = shalt.err (!%p1037_p6)
}
  0x4c   :  { %s1041_s0 = scalar_lea.vmem %s49_s14, 128  ;;  %p1046_p8 = scmp.lt.s32.totalorder %s49_s14, %s49_s14 }
  0x4d   :  { %p1042_p7 = scmp.ne.s32.totalorder %s49_s14, %s1041_s0  ;;  %p1047_p9 = scmp.lt.s32.totalorder %s1041_s0, %s1041_s0 }
  0x4f   :  { %p1048_p10 = por %p1047_p9, %p1046_p8 }
  0x51   :  { %p1049_p11 = pnand %p1048_p10, %p1042_p7 }
  0x53   :  { %1052 = shalt.err (!%p1049_p11)
}
  0x54   :  { %51 = dma.hbm_to_vmem [thread:$0]  %s1410_s2, 128, %s49_s14, [#allocation6]  }
  0x55   :  { %s1053_s1 = scalar_lea.hbm %s1414_s6, 256 }
  0x56   :  { %p1054_p12 = scmp.ne.s32.totalorder %s1414_s6, %s1053_s1  ;;  %p1057_p13 = scmp.lt.u32.totalorder %s1053_s1, %s1414_s6 }
  0x58   :  { %p1059_p0 = pnand %p1057_p13, %p1054_p12 }
  0x5a   :  { %1062 = shalt.err (!%p1059_p0)
}
  0x5b   :  { %s1063_s28 = scalar_lea.vmem %s1257_s16, 256  ;;  %p1068_p2 = scmp.lt.s32.totalorder %s1257_s16, %s1257_s16 }
  0x5c   :  { %p1064_p1 = scmp.ne.s32.totalorder %s1257_s16, %s1063_s28  ;;  %p1069_p3 = scmp.lt.s32.totalorder %s1063_s28, %s1063_s28 }
  0x5e   :  { %p1070_p4 = por %p1069_p3, %p1068_p2 }
  0x60   :  { %p1071_p5 = pnand %p1070_p4, %p1064_p1 }
  0x62   :  { %1074 = shalt.err (!%p1071_p5)
}
  0x63   :  { %s1135_s2 = smov 128   ;;  %s1136_s13 = smov 8  }
  0x64   :  { %77 = dma.hbm_to_vmem [thread:$0]  %s1414_s6, 256, %s1257_s16, [#allocation9], %s1135_s2, %s1135_s2, %s1136_s13  }
  0x65   :  { %s1137_s17 = smov [#allocation13]   ;;  %s1075_s24 = scalar_lea.hbm %s1416_s8, 128 }
  0x66   :  { %s94_s18 = sshll.u32 %s1137_s17, 4  ;;  %p1076_p6 = scmp.ne.s32.totalorder %s1416_s8, %s1075_s24  ;;  %s95_s18 = int_to_ptr.vmem [resolvable:$true] %s94_s18 }
  0x67   :  { %p1079_p7 = scmp.lt.u32.totalorder %s1075_s24, %s1416_s8 }
  0x69   :  { %p1081_p8 = pnand %p1079_p7, %p1076_p6 }
  0x6b   :  { %1084 = shalt.err (!%p1081_p8)
}
  0x6c   :  { %s1085_s23 = scalar_lea.vmem %s95_s18, 128  ;;  %p1090_p10 = scmp.lt.s32.totalorder %s95_s18, %s95_s18 }
  0x6d   :  { %p1086_p9 = scmp.ne.s32.totalorder %s95_s18, %s1085_s23  ;;  %p1091_p11 = scmp.lt.s32.totalorder %s1085_s23, %s1085_s23 }
  0x6f   :  { %p1092_p12 = por %p1091_p11, %p1090_p10 }
  0x71   :  { %p1093_p13 = pnand %p1092_p12, %p1086_p9 }
  0x73   :  { %1096 = shalt.err (!%p1093_p13)
}
  0x74   :  { %97 = dma.hbm_to_vmem [thread:$0]  %s1416_s8, 128, %s95_s18, [#allocation12]  }
  0x75   :  { %1119 = dma.done.wait [#allocation3], 128  }
  0x76   :  { %1120 = vsyncadd [#allocation3], 4294967168 }
  0x77   :  { %1121 = dma.done.wait [#allocation6], 256  }
  0x78   :  { %1122 = vsyncadd [#allocation6], 4294967040 }
  0x79   :  { %1123 = dma.done.wait [#allocation9], 384  }
  0x7a   :  { %1124 = vsyncadd [#allocation9], 4294966912 }
  0x7b   :  { %1125 = dma.done.wait [#allocation12], 256  }
  0x7c   :  { %1126 = vsyncadd [#allocation12], 4294967040  ;;  %v1138_v0 = vmov 0.0|0.0   ;;  %v1139_v1 = vmov 0.0   ;;  %vm1140_vm0 = vmmov 0   ;;  %v127_v2 = vld [vmem:[%s1411_s3] sm:$0xff] }
  0x7d   :  { %902 = vmatprep.subr.bf16.mxu1 %v1138_v0  ;;  %840 = vmatprep.subr.mxu0 %v1139_v1  ;;  %v128_v3 = vld [vmem:[%s1411_s3 + $0x8] sm:$0xff]  ;;  %v129_v4 = vld [vmem:[%s1411_s3 + $0x10] sm:$0xff]  ;;  %vm132_vm1 = vcmask 64512   ;;  %v130_v6 = vld [vmem:[%s1411_s3 + $0x18] sm:$0xff]  ;;  %vm206_vm2 = vcmask 261120   ;;  %vm375_vm3 = vcmask 130048  }
  0x7e   :  { %842 = vmatprep.mubr.msk.f32.mxu0 %vm1140_vm0, %v1139_v1  ;;  %853 = vmatprep.mubr.msk.f32.mxu1 %vm1140_vm0, %v1139_v1  ;;  %v903_v5 = vpack.c.bf16 %v128_v3, %v127_v2  ;;  %v131_v7 = vld [vmem:[#allocation8] sm:$0xff]  ;;  %v126_v8 = vld [vmem:[#allocation5] sm:$0xff]  ;;  %v286_v9 = vld [vmem:[%s1413_s5] sm:$0xff]  ;;  %v906_v11 = vpack.c.bf16 %v130_v6, %v129_v4  ;;  %s1141_s0 = smov 120   ;;  %s1142_s30 = smov 32   ;;  %vm777_vm4 = vcmask 326656  }
  0x7f   :  { %841 = vmatpush3.msra.mxu0 %v131_v7  ;;  %v287_v10 = vld [vmem:[%s1413_s5 + $0x8] sm:$0xff]  ;;  %v125_v13 = vld [vmem:[#allocation2] sm:$0xff]  ;;  %v288_v14 = vld [vmem:[%s1413_s5 + $0x10] sm:$0xff]  ;;  %s1143_s17 = smov [#allocation14]   ;;  %vm779_vm5 = vcmask 392192  }
  0x80   :  { %904 = vmatpush3.bf16.msra.mxu1 %v903_v5  ;;  %843 = vmatmul.mubr.msk.f32.vlgmr.msra.gmra.mrb[0].mxu0 %vm132_vm1, %v126_v8  ;;  %v909_v12 = vpack.c.bf16 %v287_v10, %v286_v9  ;;  %v289_v15 = vld [vmem:[%s1413_s5 + $0x18] sm:$0xff]  ;;  %v368_v19 = vld [vmem:[#allocation10] sm:$0xff]  ;;  %v369_v20 = vld [vmem:[#allocation10 + $0x8] sm:$0xff]  ;;  %s787_s18 = sshll.u32 %s1143_s17, 4  ;;  %s788_s18 = int_to_ptr.vmem [resolvable:$true] %s787_s18 }
  0x81   :  { %905 = vmatprep.subr.bf16.mxu1 %v1138_v0  ;;  %908 = vmatprep.subr.bf16.mxu0 %v1138_v0  ;;  %v912_v16 = vpack.c.bf16 %v289_v15, %v288_v14  ;;  %v801_v22 = vld [vmem:[%s1419_s11] ss:$0 sm:$0xff]  ;;  %v915_v25 = vpack.c.bf16 %v369_v20, %v368_v19  ;;  %v802_v27 = vld [vmem:[%s1419_s11 + $0x1] ss:$0 sm:$0xff]  ;;  %v804_v31 = vld [vmem:[%s1419_s11 + $0x2] ss:$0 sm:$0xff]  ;;  %p1102_p1 = scmp.lt.s32.totalorder %s788_s18, %s788_s18 }
  0x82   :  { %910 = vmatpush3.bf16.msra.mxu0 %v909_v12  ;;  %864 = vmatprep.mubr.msk.f32.mxu0 %vm1140_vm0, %v1139_v1  ;;  %v460_v37 = vld [vmem:[#allocation13] sm:$0xff]  ;;  %v459_v38 = vld [vmem:[#allocation11] sm:$0xff]  ;;  %v610_v45 = vld [vmem:[%s1417_s9] sm:$0xff] }
  0x83   :  { %911 = vmatprep.subr.bf16.mxu0 %v1138_v0  ;;  %v452_v40 = vld [vmem:[#allocation7] sm:$0xff]  ;;  %v611_v46 = vld [vmem:[%s1417_s9 + $0x8] sm:$0xff]  ;;  %v690_v49 = vld [vmem:[%s1418_s10] sm:$0xff] }
  0x84   :  { %907 = vmatpush3.bf16.msra.mxu1 %v906_v11  ;;  %v918_v48 = vpack.c.bf16 %v611_v46, %v610_v45  ;;  %v691_v50 = vld [vmem:[%s1418_s10 + $0x8] sm:$0xff]  ;;  %v808_v53 = vld [vmem:[%s1419_s11 + $0x3] ss:$0 sm:$0xff]  ;;  %v692_v57 = vld [vmem:[%s1418_s10 + $0x10] sm:$0xff] }
  0x85   :  { %879 = vmatprep.subr.mxu1 %v1139_v1  ;;  %v921_v51 = vpack.c.bf16 %v691_v50, %v690_v49  ;;  %v693_v58 = vld [vmem:[%s1418_s10 + $0x18] sm:$0xff]  ;;  %v809_v60 = vld [vmem:[%s1419_s11 + $0x4] ss:$0 sm:$0xff]  ;;  %s1097_s10 = scalar_lea.vmem %s788_s18, 128 }
  0x86   :  { %913 = vmatpush3.bf16.msra.mxu0 %v912_v16  ;;  %v924_v59 = vpack.c.bf16 %v693_v58, %v692_v57  ;;  %p1098_p0 = scmp.ne.s32.totalorder %s788_s18, %s1097_s10  ;;  %p1103_p2 = scmp.lt.s32.totalorder %s1097_s10, %s1097_s10 }
  0x87   :  { %854 = vmatmul.mubr.msk.f32.vlgmr.msra.gmra.mrb[0].mxu1 %vm206_vm2, %v125_v13  ;;  %914 = vmatprep.subr.bf16.mxu0 %v1138_v0 }
  0x88   :  { %881 = vmatprep.mubr.msk.f32.mxu1 %vm1140_vm0, %v1139_v1  ;;  %880 = vmatpush3.msra.mxu1 %v459_v38  ;;  %p1104_p3 = por %p1103_p2, %p1102_p1 }
  0x89   :  { %920 = vmatprep.subr.bf16.mxu1 %v1138_v0 }
  0x8a   :  { %p1105_p4 = pnand %p1104_p3, %p1098_p0 }
 0x153   :  { %v202_v17 = vpop.f32.mrb[0].mxu0 }
 0x154   :  { %v844_v18 = vpop.f32.mrb[1].mxu0 }
 0x15a   :  { %v276_v21 = vpop.f32.mrb[0].mxu1 }
 0x15b   :  { %v277_v23 = vadd.f32 %v276_v21, %v202_v17  ;;  %v855_v24 = vpop.f32.mrb[1].mxu1 }
 0x15d   :  { %v285_v26 = vadd.f32 %v801_v22, %v277_v23 }
 0x15f   :  { %865 = vmatmul.mubr.msk.f32.vlgmr.msra.gmra.mrb[2].mxu0 %vm206_vm2, %v285_v26 }
 0x160   :  { %916 = vmatpush3.bf16.msra.mxu0 %v915_v25  ;;  %871 = vmatprep.mubr.msk.f32.mxu0 %vm1140_vm0, %v1139_v1 }
 0x161   :  { %874 = vmatprep.subr.mxu0 %v1139_v1 }
 0x232   :  { %v364_v28 = vpop.f32.mrb[2].mxu0 }
 0x233   :  { %v365_v29 = vadd.f32 %v802_v27, %v364_v28  ;;  %v866_v30 = vpop.f32.mrb[3].mxu0 }
 0x235   :  { %872 = vmatmul.mubr.msk.f32.vlgmr.msra.gmra.mrb[4].mxu0 %vm375_vm3, %v365_v29 }
 0x236   :  { %876 = vmatprep.mubr.msk.f32.mxu0 %vm1140_vm0, %v1139_v1  ;;  %875 = vmatpush3.msra.mxu0 %v460_v37 }
 0x237   :  { %917 = vmatprep.subr.bf16.mxu0 %v1138_v0 }
 0x239   :  { %877 = vmatmul.mubr.msk.f32.vlgmr.msra.gmra.mrb[6].mxu0 %vm132_vm1, %v126_v8 }
 0x23a   :  { %888 = vmatprep.mubr.msk.f32.mxu0 %vm1140_vm0, %v1139_v1  ;;  %919 = vmatpush3.bf16.msra.mxu0 %v918_v48 }
 0x308   :  { %v445_v32 = vpop.f32.mrb[4].mxu0 }
 0x309   :  { %v446_v33 = vadd.f32 %v804_v31, %v445_v32  ;;  %v873_v34 = vpop.f32.mrb[5].mxu0 }
 0x30b   :  { %v449_v35 = vmul.f32 0.5, %v446_v33 }
 0x30c   :  { %v527_v44 = vpop.f32.mrb[6].mxu0 }
 0x30d   :  { %v450_v36 = vmul.f32 1.442695, %v449_v35  ;;  %v878_v47 = vpop.f32.mrb[7].mxu0 }
 0x30f   :  { %941 = vpow2.f32 %v450_v36 }
 0x319   :  { %v942_v39 = vpop.eup %941 }
 0x31a   :  { %454 = vrot.lane.b32.xlu0 %v942_v39, %s1141_s0 }
 0x31e   :  { %773 = vrot.lane.b32.xlu0 %v446_v33, %s1142_s30 }
 0x38c   :  { %v455_v41 = vpop.permute.xlu0 %454 }
 0x38d   :  { %v457_v42 = vmul.f32 %v455_v41, %v452_v40 }
 0x38f   :  { %v458_v43 = vadd.f32 %v457_v42, %v446_v33 }
 0x390   :  { %v774_v4 = vpop.permute.xlu0 %773 }
 0x391   :  { %882 = vmatmul.mubr.msk.f32.vlgmr.msra.gmra.mrb[2].mxu1 %vm132_vm1, %v458_v43 }
 0x392   :  { %899 = vmatprep.mubr.msk.f32.mxu1 %vm1140_vm0, %v1139_v1  ;;  %922 = vmatpush3.bf16.msra.mxu1 %v921_v51 }
 0x393   :  { %923 = vmatprep.subr.bf16.mxu1 %v1138_v0  ;;  %v811_v0 = vld [vmem:[%s1419_s11 + $0x5] ss:$0 sm:$0xff] }
 0x396   :  { %925 = vmatpush3.bf16.msra.mxu1 %v924_v59 }
 0x464   :  { %v600_v52 = vpop.f32.mrb[2].mxu1 }
 0x465   :  { %v601_v54 = vadd.f32 %v600_v52, %v527_v44  ;;  %v883_v55 = vpop.f32.mrb[3].mxu1 }
 0x467   :  { %v609_v56 = vadd.f32 %v808_v53, %v601_v54 }
 0x469   :  { %889 = vmatmul.mubr.msk.f32.vlgmr.msra.gmra.mrb[8].mxu0 %vm375_vm3, %v609_v56 }
 0x53c   :  { %v686_v61 = vpop.f32.mrb[8].mxu0 }
 0x53d   :  { %v687_v62 = vadd.f32 %v809_v60, %v686_v61  ;;  %v890_v63 = vpop.f32.mrb[9].mxu0 }
 0x53f   :  { %900 = vmatmul.mubr.msk.f32.vlgmr.msra.gmra.mrb[4].mxu1 %vm206_vm2, %v687_v62 }
 0x612   :  { %v768_v1 = vpop.f32.mrb[4].mxu1 }
 0x613   :  { %v769_v2 = vadd.f32 %v811_v0, %v768_v1  ;;  %v901_v3 = vpop.f32.mrb[5].mxu1 }
 0x615   :  { %v776_v5 = vsel %vm206_vm2, %v769_v2, %v774_v4 }
 0x616   :  { %v778_v6 = vsel %vm777_vm4, %v776_v5, %v774_v4 }
 0x617   :  { %780 = vst.msk [vmem:[#allocation14] sm:$0xff] %vm779_vm5, %v778_v6 }
 0x618   :  { %1108 = shalt.err (!%p1105_p4)
}
 0x619   :  { %s1109_s4 = scalar_lea.hbm %s1420_s12, 128 }
 0x61a   :  { %p1110_p5 = scmp.ne.s32.totalorder %s1420_s12, %s1109_s4  ;;  %p1113_p6 = scmp.lt.u32.totalorder %s1109_s4, %s1420_s12 }
 0x61c   :  { %p1115_p7 = pnand %p1113_p6, %p1110_p5 }
 0x61e   :  { %1118 = shalt.err (!%p1115_p7)
}
 0x61f   :  { %790 = dma.vmem_to_hbm [thread:$0]  %s788_s18, 128, %s1420_s12, [#allocation4]  }
 0x620   :  { %1127 = dma.done.wait [#allocation4], 128  }
 0x621   :  { %1128 = vsyncadd [#allocation4], 4294967168 }
 0x622   :  { %794 = vsyncpa [#allocation3], 1 }
 0x623   :  { %795 = vsyncpa [#allocation6], 1 }
 0x624   :  { %796 = vsyncpa [#allocation9], 1 }
 0x625   :  { %797 = vsyncpa [#allocation12], 1 }
 0x626   :  { %798 = vsyncpa [#allocation4], 1 }

</bundles_post_ra>
